<compile_context>
chip_gen: v6e
topology: v6e:2x2x1
jax: 0.10.0
libtpu: 0.0.40
codegen_flags: <defaults>
</compile_context>

<pallas_src>
import functools

import jax
import jax.numpy as jnp
from jax import lax
from jax.experimental import pallas as pl
from jax.experimental.pallas import tpu as pltpu


def _lrn_kernel(x_ref, o_ref, *, size, alpha, beta, k):
    # x_ref / o_ref: (BN, C, TILE_HW) VMEM tiles.
    x = x_ref[...].astype(jnp.float32)
    _, C, _ = x.shape
    half = (size - 1) // 2

    sq = x * x
    acc = sq
    if half > 0:
        # Per-row channel index only: (1, C, 1) iota -> tiny compares, broadcast
        # into the selects (no block-sized int32 temporary).
        ch = lax.broadcasted_iota(jnp.int32, (1, C, 1), 1)
        for d in range(1, half + 1):
            # Row c receives sq[c + d] (wrapped rows masked off).
            up = pltpu.roll(sq, shift=(C - d) % C, axis=1)
            # Row c receives sq[c - d] (wrapped rows masked off).
            dn = pltpu.roll(sq, shift=d % C, axis=1)
            acc = acc + jnp.where(ch < C - d, up, 0.0) + jnp.where(ch >= d, dn, 0.0)

    scale = k + (alpha / size) * acc  # divisor is `size`, per Caffe / legacy torch
    if abs(beta - 0.75) < 1e-12:
        inv = lax.rsqrt(scale)            # scale^-0.5   (EUP)
        out = x * (inv * jnp.sqrt(inv))   # scale^-0.75
    else:
        out = x * jnp.exp(-beta * jnp.log(scale))
    o_ref[...] = out.astype(o_ref.dtype)


def _vmem_budgets():
    """(target I/O block bytes, vmem_limit_bytes) per TPU generation."""
    cap = 64 * 1024 * 1024
    try:
        info = pltpu.get_tpu_info()
        cap = int(getattr(info, "vmem_capacity_bytes", cap))
    except Exception:
        pass
    if cap >= 96 * 1024 * 1024:
        # v5e / v6e: 128 MiB physical VMEM -> larger blocks, raise scoped limit.
        return 4 * 1024 * 1024, 64 * 1024 * 1024
    # v7x: 64 MiB per TensorCore -> cap block size, keep limit conservative
    # (2x double-buffered in + 2x out + ~4-5 block-sized f32 temporaries).
    return 2 * 1024 * 1024, 40 * 1024 * 1024


def _choose_blocks(N, C, HW, itemsize, target_block_bytes):
    """Pick (batch block, spatial tile) from the VMEM budget.

    No divisibility requirement on HW: the grid uses cdiv and the last block is
    partial.  TILE_HW is always a multiple of 128 (lane-dense)."""
    hw128 = -(-HW // 128) * 128
    lane_budget = max(1, target_block_bytes // max(1, C * itemsize))
    tile_hw = max(128, (min(hw128, lane_budget) // 128) * 128)
    nt = -(-HW // tile_hw)

    bn = 1
    if nt == 1 and N > 1:
        # Small spatial extent: block batches too so each grid step moves a
        # decent DMA, but keep >=2 grid points so megacore (v7x) can shard.
        per_batch_bytes = C * tile_hw * itemsize
        bn = max(1, min(N, target_block_bytes // max(1, per_batch_bytes)))
        bn = min(bn, max(1, N // 2))
    return bn, tile_hw, nt


def lrn(x, *, size, alpha=1e-4, beta=0.75, k=1.0):
    """Cross-map LRN over an NCHW tensor using a Pallas TPU kernel."""
    N, C, H, W = x.shape
    HW = H * W
    x3 = x.reshape(N, C, HW)

    itemsize = jnp.dtype(x.dtype).itemsize
    target_block_bytes, vmem_limit = _vmem_budgets()
    bn, tile_hw, nt = _choose_blocks(N, C, HW, itemsize, target_block_bytes)
    grid = (-(-N // bn), nt)

    kernel = functools.partial(_lrn_kernel, size=int(size), alpha=float(alpha),
                               beta=float(beta), k=float(k))

    out3 = pl.pallas_call(
        kernel,
        out_shape=jax.ShapeDtypeStruct((N, C, HW), x.dtype),
        grid_spec=pltpu.PrefetchScalarGridSpec(
            num_scalar_prefetch=0,
            grid=grid,
            in_specs=[pl.BlockSpec((bn, C, tile_hw), lambda n, s: (n, 0, s))],
            out_specs=pl.BlockSpec((bn, C, tile_hw), lambda n, s: (n, 0, s)),
        ),
        compiler_params=pltpu.CompilerParams(
            dimension_semantics=("parallel", "parallel"),
            vmem_limit_bytes=vmem_limit,
        ),
    )(x3)

    return out3.reshape(N, C, H, W)


def _lrn_reference(x, *, size, alpha=1e-4, beta=0.75, k=1.0):
    """Pure-JAX reference with identical semantics (for verification)."""
    N, C, H, W = x.shape
    half = (size - 1) // 2
    sq = (x.astype(jnp.float32)) ** 2
    sq_pad = jnp.pad(sq, ((0, 0), (half, half), (0, 0), (0, 0)))
    acc = jnp.zeros_like(sq)
    for w in range(2 * half + 1):
        acc = acc + sq_pad[:, w:w + C, :, :]
    scale = k + (alpha / size) * acc
    return (x.astype(jnp.float32) / scale ** beta).astype(x.dtype)


if __name__ == "__main__":
    key = jax.random.PRNGKey(0)
    size, alpha, beta, k = 5, 1e-4, 0.75, 1.0

    # Small NCHW input consistent with the module's forward.
    N, C, H, W = 2, 8, 16, 16
    x = jax.random.normal(key, (N, C, H, W), dtype=jnp.float32)
    out = jax.block_until_ready(lrn(x, size=size, alpha=alpha, beta=beta, k=k))
    ref = _lrn_reference(x, size=size, alpha=alpha, beta=beta, k=k)
    assert out.shape == (N, C, H, W)
    assert jnp.allclose(out, ref, atol=1e-5, rtol=1e-5), "Pallas LRN mismatch vs reference"

    # Ragged spatial extent (HW % 128 != 0) exercises the no-pad partial-block path.
    key2 = jax.random.PRNGKey(1)
    N2, C2, H2, W2 = 2, 8, 13, 13
    x2 = jax.random.normal(key2, (N2, C2, H2, W2), dtype=jnp.float32)
    out2 = jax.block_until_ready(lrn(x2, size=size, alpha=alpha, beta=beta, k=k))
    ref2 = _lrn_reference(x2, size=size, alpha=alpha, beta=beta, k=k)
    assert out2.shape == (N2, C2, H2, W2)
    assert jnp.allclose(out2, ref2, atol=1e-5, rtol=1e-5), "Pallas LRN mismatch vs reference (ragged)"

    print("KERNEL_OK")
</pallas_src>

<mosaic_0001>
module attributes {stable_mosaic.version = 11 : i64} {
  func.func @_lrn_kernel(%arg0: i32, %arg1: i32, %arg2: memref<1x8x256xf32, #tpu.memory_space<vmem>>, %arg3: memref<1x8x256xf32, #tpu.memory_space<vmem>>) attributes {dimension_semantics = [#tpu.dimension_semantics<parallel>, #tpu.dimension_semantics<parallel>], iteration_bounds = array<i64: 2, 1>, scalar_prefetch = 0 : i64, scratch_operands = 0 : i64, tpu.core_type = #tpu.core_type<tc>, window_params = [{transform_indices = @transform_0, window_bounds = array<i64: 1, 8, 256>}, {transform_indices = @transform_1, window_bounds = array<i64: 1, 8, 256>}]} {
    %c0 = arith.constant 0 : index
    %c0_0 = arith.constant 0 : index
    %c0_1 = arith.constant 0 : index
    %0 = vector.load %arg2[%c0, %c0_0, %c0_1] : memref<1x8x256xf32, #tpu.memory_space<vmem>>, vector<1x8x256xf32>
    %1 = arith.mulf %0, %0 : vector<1x8x256xf32>
    %2 = tpu.iota {dimensions = array<i32: 1>} : vector<1x8x1xi32>
    %c7_i32 = arith.constant 7 : i32
    %3 = tpu.dynamic_rotate %1 by %c7_i32 dim 1 : vector<1x8x256xf32>, i32 -> vector<1x8x256xf32>
    %c1_i32 = arith.constant 1 : i32
    %4 = tpu.dynamic_rotate %1 by %c1_i32 dim 1 : vector<1x8x256xf32>, i32 -> vector<1x8x256xf32>
    %c7_i32_2 = arith.constant 7 : i32
    %5 = vector.broadcast %c7_i32_2 : i32 to vector<1x8x1xi32>
    %6 = arith.cmpi slt, %2, %5 : vector<1x8x1xi32>
    %cst = arith.constant 0.000000e+00 : f32
    %7 = vector.shape_cast %6 : vector<1x8x1xi1> to vector<1x8x1xi1>
    %8 = vector.broadcast %7 : vector<1x8x1xi1> to vector<1x8x256xi1>
    %9 = vector.broadcast %cst : f32 to vector<1x8x256xf32>
    %10 = arith.select %8, %3, %9 : vector<1x8x256xi1>, vector<1x8x256xf32>
    %11 = arith.addf %1, %10 : vector<1x8x256xf32>
    %c1_i32_3 = arith.constant 1 : i32
    %12 = vector.broadcast %c1_i32_3 : i32 to vector<1x8x1xi32>
    %13 = arith.cmpi sge, %2, %12 : vector<1x8x1xi32>
    %cst_4 = arith.constant 0.000000e+00 : f32
    %14 = vector.shape_cast %13 : vector<1x8x1xi1> to vector<1x8x1xi1>
    %15 = vector.broadcast %14 : vector<1x8x1xi1> to vector<1x8x256xi1>
    %16 = vector.broadcast %cst_4 : f32 to vector<1x8x256xf32>
    %17 = arith.select %15, %4, %16 : vector<1x8x256xi1>, vector<1x8x256xf32>
    %18 = arith.addf %11, %17 : vector<1x8x256xf32>
    %c6_i32 = arith.constant 6 : i32
    %19 = tpu.dynamic_rotate %1 by %c6_i32 dim 1 : vector<1x8x256xf32>, i32 -> vector<1x8x256xf32>
    %c2_i32 = arith.constant 2 : i32
    %20 = tpu.dynamic_rotate %1 by %c2_i32 dim 1 : vector<1x8x256xf32>, i32 -> vector<1x8x256xf32>
    %c6_i32_5 = arith.constant 6 : i32
    %21 = vector.broadcast %c6_i32_5 : i32 to vector<1x8x1xi32>
    %22 = arith.cmpi slt, %2, %21 : vector<1x8x1xi32>
    %cst_6 = arith.constant 0.000000e+00 : f32
    %23 = vector.shape_cast %22 : vector<1x8x1xi1> to vector<1x8x1xi1>
    %24 = vector.broadcast %23 : vector<1x8x1xi1> to vector<1x8x256xi1>
    %25 = vector.broadcast %cst_6 : f32 to vector<1x8x256xf32>
    %26 = arith.select %24, %19, %25 : vector<1x8x256xi1>, vector<1x8x256xf32>
    %27 = arith.addf %18, %26 : vector<1x8x256xf32>
    %c2_i32_7 = arith.constant 2 : i32
    %28 = vector.broadcast %c2_i32_7 : i32 to vector<1x8x1xi32>
    %29 = arith.cmpi sge, %2, %28 : vector<1x8x1xi32>
    %cst_8 = arith.constant 0.000000e+00 : f32
    %30 = vector.shape_cast %29 : vector<1x8x1xi1> to vector<1x8x1xi1>
    %31 = vector.broadcast %30 : vector<1x8x1xi1> to vector<1x8x256xi1>
    %32 = vector.broadcast %cst_8 : f32 to vector<1x8x256xf32>
    %33 = arith.select %31, %20, %32 : vector<1x8x256xi1>, vector<1x8x256xf32>
    %34 = arith.addf %27, %33 : vector<1x8x256xf32>
    %cst_9 = arith.constant 2.000000e-05 : f32
    %35 = vector.broadcast %cst_9 : f32 to vector<1x8x256xf32>
    %36 = arith.mulf %35, %34 : vector<1x8x256xf32>
    %cst_10 = arith.constant 1.000000e+00 : f32
    %37 = vector.broadcast %cst_10 : f32 to vector<1x8x256xf32>
    %38 = arith.addf %37, %36 : vector<1x8x256xf32>
    %39 = math.rsqrt %38 : vector<1x8x256xf32>
    %40 = math.sqrt %39 : vector<1x8x256xf32>
    %41 = arith.mulf %39, %40 : vector<1x8x256xf32>
    %42 = arith.mulf %0, %41 : vector<1x8x256xf32>
    %c0_11 = arith.constant 0 : index
    %c0_12 = arith.constant 0 : index
    %c0_13 = arith.constant 0 : index
    %43 = vector.load %arg3[%c0_11, %c0_12, %c0_13] : memref<1x8x256xf32, #tpu.memory_space<vmem>>, vector<1x8x256xf32>
    tpu.vector_store %arg3[%c0_11, %c0_12, %c0_13], %42 {strides = array<i32>} : memref<1x8x256xf32, #tpu.memory_space<vmem>>, vector<1x8x256xf32>,
    return
  }
  func.func @transform_0(%arg0: i32, %arg1: i32) -> (i32, i32, i32) {
    %c0_i32 = arith.constant 0 : i32
    %c0_i32_0 = arith.constant 0 : i32
    return %arg0, %c0_i32, %arg1 : i32, i32, i32
  }
  func.func @transform_1(%arg0: i32, %arg1: i32) -> (i32, i32, i32) {
    %c0_i32 = arith.constant 0 : i32
    %c0_i32_0 = arith.constant 0 : i32
    return %arg0, %c0_i32, %arg1 : i32, i32, i32
  }
}

</mosaic_0001>

<bundles_post_ra>
// kernel: tpu_custom_call.1
= control target key start
LH: loop header
LB: loop body
LE: loop exit
PB: predicated region body
PF: predicated region fallthrough
CT: control target
= control target key end

     0   :  { %6 = vsyncpa [#allocation3], 0  ;;  %s675_s0 = inlined_call_operand.hbm [shape: f32[2,8,256], index: 0, kind: input, shape index: {}]   ;;  %s676_s1 = inlined_call_operand.hbm [shape: f32[2,8,256], index: 1, kind: output, shape index: {}]  }
   0x1   :  { %8 = vsyncpa [#allocation3 + $0x1], 0 }
   0x2   :  { %9 = vsyncpa [#allocation4], 0 }
   0x3   :  { %11 = vsyncpa [#allocation4 + $0x1], 0  ;;  %s531_s6 = smov 0   ;;  %s533_s7 = smov 0  }
   0x4   :  { %s535_s8 = smov 0   ;;  %s537_s9 = smov 0  }
   0x5   :  { %s539_s10 = smov 0   ;;  %s541_s11 = smov 0  }
   0x6 LB: > { %s322_s12 = sadd.s32 4294967295, %s517_s11   ;;  %s323_s13 = sadd.s32 4294967294, %s517_s11   ;;  %s517_s11 = sphi %s541_s11, %s17_s11   ;;  %s513_s10 = sphi %s539_s10, %s688_s10   ;;  %s509_s9 = sphi %s537_s9, %s687_s9   ;;  %s505_s8 = sphi %s535_s8, %s686_s8   ;;  %s501_s7 = sphi %s533_s7, %s685_s7   ;;  %s497_s6 = sphi %s531_s6, %s684_s6  }
   0x7   : > { %s29_s14 = sadd.s32 1, %s513_s10  ;;  %s38_s15 = sadd.s32 1, %s505_s8 }
   0x8   : > { %p31_p0 = scmp.ge.s32.totalorder %s29_s14, 2  ;;  %p45_p1 = scmp.ne.s32.totalorder %s505_s8, %s501_s7 }
   0x9   : > { %p46_p2 = scmp.eq.s32.totalorder %s517_s11, 0  ;;  %p51_p3 = scmp.ne.s32.totalorder %s501_s7, %s497_s6 }
   0xa   : > { %s690_s14 = smov (%p31_p0, %s29_s14), 0  ;;  %p52_p5 = scmp.eq.s32.totalorder %s322_s12, 0 }
   0xb   : > { %p572_p4 = por %p46_p2, %p45_p1  ;;  %s33_s17 = ssub.s32 %s513_s10, %s690_s14 }
   0xc   : > { %p77_p6 = scmp.eq.s32.totalorder %s322_s12, 1  ;;  %p36_p7 = scmp.eq.s32.totalorder %s33_s17, 0 }
   0xd   : > { %p578_p8 = por %p52_p5, %p51_p3  ;;  %p83_p10 = scmp.eq.s32.totalorder %s323_s13, 1 }
   0xe   : > { %p582_p9 = por %p77_p6, %p45_p1  ;;  %p351_p13 = scmp.lt.s32.totalorder %s517_s11, 2 }
   0xf   : > { %s587_s20 = scalar_select %p36_p7, %s505_s8, %s38_s15  }
  0x10   : > { %p589_p11 = por %p83_p10, %p51_p3  ;;  %s103_s22 = sand.u32 1, %s505_s8  }
  0x11   : > { %s326_s23 = sshll.u32 %s103_s22, 4  ;;  %s337_s24 = sshll.u32 %s513_s10, 8 }
  0x12   : > { %s680_s21 = scalar_select %p589_p11, 1, 0 }
  0x13   : > { %s115_s27 = scalar_lea.hbm %s675_s0, %s337_s24  ;;  %s107_s28 = scalar_lea.vmem [#allocation2], %s326_s23 }
  0x14   : > { %s117_s29 = sshll.u32 %s107_s28, 4  ;;  %p602_p0 = pnand %p351_p13, %p572_p4  ;;  %s118_s29 = int_to_ptr.vmem [resolvable:$true] %s117_s29 }
  0x15   : > { %p329_p1 = scmp.ge.s32.totalorder %s517_s11, 1  ;;  %p122_p2 = scmp.lt.s32.totalorder %s517_s11, 3 }
  0x16   : > { %s104_s2 = scalar_lea.sflag [#allocation3], %s103_s22  ;;  %p411_p3 = pneg %p602_p0 }
  0x17   : > { %s422_s3 = scalar_lea.vmem %s118_s29, 256  ;;  %s519_s4 = smov [#allocation2]  }
  0x18   : > { %p423_p5 = scmp.ne.s32.totalorder %s118_s29, %s422_s3  ;;  %s427_s5 = sshll.u32 %s519_s4, 4  ;;  %s428_s5 = int_to_ptr.vmem [resolvable:$false] %s427_s5 }
  0x19   : > { %s429_s12 = scalar_lea.vmem %s428_s5, 512  ;;  %p430_p10 = scmp.lt.s32.totalorder %s118_s29, %s428_s5 }
  0x1a   : > { %p425_p6 = pnand %p423_p5, %p411_p3  ;;  %p431_p12 = scmp.lt.s32.totalorder %s429_s12, %s422_s3 }
  0x1c   : > { %p426_p7 = pneg %p425_p6  ;;  %p432_p4 = por %p431_p12, %p430_p10 }
  0x1e   : > { %p433_p13 = pnand %p432_p4, %p426_p7 }
  0x20   : > { %436 = shalt.err (!%p433_p13)
}
  0x21   : > { %346 = dma.hbm_to_vmem [thread:$0]  (!%p602_p0), %s115_s27, 256, %s118_s29, %s104_s2  }
  0x22   : > { %p123_p11 = pnand %p329_p1, %p122_p2 }
  0x23   : > { %s617_s13 = sand.u32 (!%p123_p11), 1, %s501_s7  }
  0x24   : > { %126 = sbr.rel (%p123_p11) target bundleno = 110 (0x6e), region = 24  ;;  %s330_s15 = sshll.u32 (!%p123_p11), %s617_s13, 4 }
  0x25   : > { %s129_s16 = scalar_lea.sflag (!%p123_p11), [#allocation3], %s617_s13  ;;  %s132_s17 = scalar_lea.vmem (!%p123_p11), [#allocation2], %s330_s15 }
  0x29   : > { %488 = dma.done.wait (%p578_p8), %s129_s16, 256  }
  0x2a   : > { %490 = vsyncadd (%p578_p8), %s129_s16, 4294967040  ;;  %v157_v0 = vlaneseq  ;;  %v153_v2 = vld [vmem:[%s132_s17] sm:$0xff]  ;;  %v154_v3 = vld [vmem:[%s132_s17 + $0x8] sm:$0xff]  ;;  %s150_s18 = scalar_lea.vmem [#allocation5], %s330_s15  ;;  %s338_s23 = sshll.u32 %s509_s9, 8 }
  0x2b   : > { %v155_v4 = vmul.f32 %v153_v2, %v153_v2  ;;  %v156_v5 = vmul.f32 %v154_v3, %v154_v3  ;;  %s238_s22 = sshll.u32 %s150_s18, 4  ;;  %s236_s26 = scalar_lea.hbm %s676_s1, %s338_s23  ;;  %s630_s22 = int_to_ptr.vmem [resolvable:$true] %s238_s22 }
  0x2c   : > { %v158_v1 = vshrl.u32 %v157_v0, 7  ;;  %s222_s27 = scalar_lea.sflag [#allocation4], %s617_s13  ;;  %s437_s28 = scalar_lea.vmem %s630_s22, 256 }
  0x2d   : > { %v159_v6 = vrot.slane %v155_v4, 1  ;;  %v161_v7 = vrot.slane %v155_v4, 7  ;;  %v177_v8 = vrot.slane %v155_v4, 2  ;;  %v160_v9 = vrot.slane %v156_v5, 1  ;;  %p438_p8 = scmp.ne.s32.totalorder %s630_s22, %s437_s28  ;;  %s520_s9 = smov [#allocation5]  }
  0x2e   : > { %vm163_vm0 = vcmp.lt.s32.totalorder %v158_v1, 7  ;;  %vm170_vm1 = vcmp.ge.s32.totalorder %v158_v1, 1  ;;  %vm181_vm2 = vcmp.lt.s32.totalorder %v158_v1, 6  ;;  %v162_v10 = vrot.slane %v156_v5, 7  ;;  %s441_s29 = sshll.u32 %s520_s9, 4  ;;  %s442_s29 = int_to_ptr.vmem [resolvable:$false] %s441_s29 }
  0x2f   : > { %v178_v11 = vrot.slane %v156_v5, 2  ;;  %v166_v12 = vsel %vm163_vm0, %v159_v6, 0.0  ;;  %v173_v13 = vsel %vm170_vm1, %v161_v7, 0.0  ;;  %v179_v14 = vrot.slane %v155_v4, 6  ;;  %p439_p11 = pnand %p438_p8, %p582_p9  ;;  %s443_s30 = scalar_lea.vmem %s442_s29, 512 }
  0x30   : > { %vm188_vm3 = vcmp.ge.s32.totalorder %v158_v1, 2  ;;  %v168_v15 = vadd.f32 %v166_v12, %v155_v4  ;;  %v167_v16 = vsel %vm163_vm0, %v160_v9, 0.0  ;;  %v174_v17 = vsel %vm170_vm1, %v162_v10, 0.0  ;;  %p444_p0 = scmp.lt.s32.totalorder %s630_s22, %s442_s29  ;;  %p445_p1 = scmp.lt.s32.totalorder %s443_s30, %s437_s28 }
  0x31   : > { %v180_v18 = vrot.slane %v156_v5, 6  ;;  %v184_v19 = vsel %vm181_vm2, %v177_v8, 0.0  ;;  %v169_v20 = vadd.f32 %v167_v16, %v156_v5  ;;  %v185_v22 = vsel %vm181_vm2, %v178_v11, 0.0  ;;  %p440_p12 = pneg %p439_p11 }
  0x32   : > { %v175_v21 = vadd.f32 %v173_v13, %v168_v15  ;;  %v191_v23 = vsel %vm188_vm3, %v179_v14, 0.0  ;;  %p446_p2 = por %p445_p1, %p444_p0 }
  0x33   : > { %v176_v24 = vadd.f32 %v174_v17, %v169_v20  ;;  %v192_v26 = vsel %vm188_vm3, %v180_v18, 0.0 }
  0x34   : > { %v186_v25 = vadd.f32 %v184_v19, %v175_v21  ;;  %p447_p3 = pnand %p446_p2, %p440_p12 }
  0x35   : > { %v187_v27 = vadd.f32 %v185_v22, %v176_v24 }
  0x36   : > { %v193_v28 = vadd.f32 %v191_v23, %v186_v25 }
  0x37   : > { %v194_v29 = vadd.f32 %v192_v26, %v187_v27 }
  0x38   : > { %v195_v30 = vmul.f32 2e-05, %v193_v28 }
  0x39   : > { %v196_v31 = vmul.f32 2e-05, %v194_v29 }
  0x3a   : > { %v197_v32 = vadd.f32 1.0, %v195_v30 }
  0x3b   : > { %v198_v33 = vadd.f32 1.0, %v196_v31 }
  0x3c   : > { %401 = vrsqrt.f32 %v197_v32 }
  0x3d   : > { %403 = vrsqrt.f32 %v198_v33 }
  0x49   : > { %v402_v34 = vpop.eup %401 }
  0x4a   : > { %v404_v35 = vpop.eup %403  ;;  %405 = vrsqrt.f32 %v402_v34  ;;  %vm203_vm4 = vcmp.eq.f32.partialorder %v402_v34, inf  ;;  %v206_v37 = vand.u32 2147483648, %v402_v34  ;;  %vm205_vm5 = vcmp.eq.f32.partialorder %v402_v34, 0.0 }
  0x4b   : > { %407 = vrsqrt.f32 %v404_v35  ;;  %vm210_vm6 = vcmp.eq.f32.partialorder %v404_v35, inf  ;;  %v213_v40 = vand.u32 2147483648, %v404_v35  ;;  %vm212_vm7 = vcmp.eq.f32.partialorder %v404_v35, 0.0 }
  0x57   : > { %v406_v36 = vpop.eup %405 }
  0x58   : > { %v408_v38 = vpop.eup %407  ;;  %v202_v39 = vmul.f32 %v406_v36, %v402_v34 }
  0x59   : > { %v209_v41 = vmul.f32 %v408_v38, %v404_v35 }
  0x5a   : > { %v204_v42 = vsel %vm203_vm4, %v402_v34, %v202_v39 }
  0x5b   : > { %v207_v43 = vsel %vm205_vm5, %v206_v37, %v204_v42  ;;  %v211_v44 = vsel %vm210_vm6, %v404_v35, %v209_v41 }
  0x5c   : > { %v215_v45 = vmul.f32 %v402_v34, %v207_v43  ;;  %v214_v46 = vsel %vm212_vm7, %v213_v40, %v211_v44 }
  0x5d   : > { %v216_v47 = vmul.f32 %v404_v35, %v214_v46 }
  0x5e   : > { %v217_v48 = vmul.f32 %v215_v45, %v153_v2 }
  0x5f   : > { %v218_v49 = vmul.f32 %v216_v47, %v154_v3 }
  0x60   : > { %219 = vst [vmem:[%s150_s18] sm:$0xff] %v217_v48 }
  0x61   : > { %220 = vst [vmem:[%s150_s18 + $0x8] sm:$0xff] %v218_v49 }
  0x62   : > { %450 = shalt.err (!%p447_p3)
}
  0x63   : > { %s451_s2 = scalar_lea.hbm %s236_s26, 256  ;;  %s455_s5 = scalar_lea.hbm %s676_s1, 512 }
  0x64   : > { %p452_p5 = scmp.ne.s32.totalorder %s236_s26, %s451_s2  ;;  %p456_p10 = scmp.lt.s32.totalorder %s236_s26, %s676_s1 }
  0x65   : > { %p457_p4 = scmp.lt.s32.totalorder %s455_s5, %s451_s2 }
  0x66   : > { %p453_p6 = pnand %p452_p5, %p582_p9 }
  0x67   : > { %p458_p13 = por %p457_p4, %p456_p10 }
  0x68   : > { %p454_p7 = pneg %p453_p6 }
  0x6a   : > { %p459_p8 = pnand %p458_p13, %p454_p7 }
  0x6c   : > { %462 = shalt.err (!%p459_p8)
}
  0x6d   : > { %341 = dma.vmem_to_hbm [thread:$0]  (%p582_p9), %s630_s22, 256, %s236_s26, %s222_s27  }
  0x6e PF: > { %s250_s15 = sand.u32 1, %s497_s6   ;;  %p682_p11 = scmp.ne.s32.totalorder %s680_s21, 0 }
  0x6f   : > { %p683_p12 = scmp.ge.s32.totalorder %s517_s11, 2  ;;  %s251_s16 = scalar_lea.sflag [#allocation4], %s250_s15 }
  0x71   : > { %p348_p0 = pnand %p683_p12, %p682_p11 }
  0x73   : > { %p349_p1 = pneg %p348_p0 }
  0x75   : > { %492 = dma.done.wait (%p349_p1), %s251_s16, 256  }
  0x76   : > { %494 = vsyncadd (%p349_p1), %s251_s16, 4294967040  ;;  %s17_s11 = sadd.s32 1, %s517_s11   ;;  %s684_s6 = smov %s501_s7 }
  0x77   : > { %p14_p2 = scmp.ge.s32.totalorder %s17_s11, 4   ;;  %s685_s7 = smov %s505_s8 }
  0x78   : > { %s686_s8 = smov %s587_s20  ;;  %s687_s9 = smov %s513_s10 }
  0x79   : > { %s688_s10 = smov %s690_s14  ;;  %16 = sbr.rel (!%p14_p2) target bundleno = 6 (0x6), region = 69 }
  0x7e   :  { %256 = vsyncpa [#allocation3], 1 }
  0x7f   :  { %258 = vsyncpa [#allocation3 + $0x1], 1 }
  0x80   :  { %259 = vsyncpa [#allocation4], 1 }
  0x81   :  { %261 = vsyncpa [#allocation4 + $0x1], 1 }

</bundles_post_ra>
